<compile_context>
chip_gen: v5e
topology: v5e:2x2
jax: 0.10.0
libtpu: 0.0.40
codegen_flags: <defaults>
</compile_context>

<pallas_src>
import functools
import math

import jax
import jax.numpy as jnp
from jax.experimental import pallas as pl
from jax.experimental.pallas import tpu as pltpu


# ----------------------------- shared math -------------------------------- #

def _layer_norm(x, g, b, eps=1e-12):
    mu = jnp.mean(x, axis=-1, keepdims=True)
    var = jnp.mean((x - mu) ** 2, axis=-1, keepdims=True)
    return (x - mu) * jax.lax.rsqrt(var + eps) * g + b


# ----------------------------- Pallas kernels ----------------------------- #

def bert_layer_kernel(num_heads, head_dim, pool,
                      x_ref, mask_ref,
                      wqkv_ref, bqkv_ref, wo_ref, bo_ref, ln1g_ref, ln1b_ref,
                      wi_ref, bi_ref, wo2_ref, bo2_ref, ln2g_ref, ln2b_ref,
                      out_ref):
    """One post-LN BERT layer for a single batch element (grid over batch).

    If `pool` is True this is the final layer: the kernel also performs
    output[:, 1:-1, :].sum(dim=1) followed by L2 normalization and writes the
    pooled (1, H) embedding instead of the full hidden state.
    """
    x = x_ref[0]              # (S, H) f32
    mask_bias = mask_ref[0]   # (1, S) additive: 0 for real tokens, -1e4 for padding
    S, H = x.shape

    # --- fused QKV projection: one bf16 MXU call, f32 accumulation ---
    qkv = jnp.dot(x.astype(jnp.bfloat16), wqkv_ref[...],
                  preferred_element_type=jnp.float32) + bqkv_ref[...]   # (S, 3H)

    # --- build head-major (nh, S, hd) operands (data movement only) ---
    def heads(off):
        parts = [qkv[:, off + h * head_dim: off + (h + 1) * head_dim][None]
                 for h in range(num_heads)]
        return jnp.concatenate(parts, axis=0).astype(jnp.bfloat16)      # (nh, S, hd)

    qh = heads(0)
    kh = heads(H)
    vh = heads(2 * H)

    # --- attention: one dot_general batched over heads (no per-head matmuls) ---
    scale = 1.0 / math.sqrt(head_dim)
    scores = jnp.einsum('hqd,hkd->hqk', qh, kh,
                        preferred_element_type=jnp.float32) * scale      # (nh, S, S)
    scores = scores + mask_bias[None]                                    # + (1,1,S)
    scores = scores - jnp.max(scores, axis=-1, keepdims=True)
    p = jnp.exp(scores)
    p = p * pl.reciprocal(jnp.sum(p, axis=-1, keepdims=True), approx=True)
    ctx = jnp.einsum('hqk,hkd->hqd', p.astype(jnp.bfloat16), vh,
                     preferred_element_type=jnp.float32)                 # (nh, S, hd)
    ctx = jnp.concatenate([ctx[h] for h in range(num_heads)], axis=-1)   # (S, H)

    attn_out = jnp.dot(ctx.astype(jnp.bfloat16), wo_ref[...],
                       preferred_element_type=jnp.float32) + bo_ref[...]
    h1 = _layer_norm(x + attn_out, ln1g_ref[...], ln1b_ref[...])

    # --- FFN ---
    inter = jnp.dot(h1.astype(jnp.bfloat16), wi_ref[...],
                    preferred_element_type=jnp.float32) + bi_ref[...]
    # TODO(synk): HF BERT uses erf-based GELU; tanh approximation for robust Mosaic lowering.
    inter = jax.nn.gelu(inter, approximate=True)
    ffn = jnp.dot(inter.astype(jnp.bfloat16), wo2_ref[...],
                  preferred_element_type=jnp.float32) + bo2_ref[...]
    out = _layer_norm(h1 + ffn, ln2g_ref[...], ln2b_ref[...])

    if pool:
        # F.normalize(hidden[:, 1:-1, :].sum(dim=1), p=2, eps=1e-12), fused here
        # to avoid an extra (B, S, H) HBM round trip + kernel launch.
        s = jnp.sum(out[1:-1, :], axis=0, keepdims=True)                 # (1, H)
        inv = jax.lax.rsqrt(jnp.maximum(jnp.sum(s * s, axis=-1, keepdims=True), 1e-24))
        out_ref[...] = (s * inv).astype(out_ref.dtype)
    else:
        out_ref[0] = out.astype(out_ref.dtype)


# ------------------------------ JAX wrappers ------------------------------ #

def bert_layer(x, mask_bias, p, num_heads, pool=False):
    B, S, H = x.shape
    I = p["wi"].shape[1]
    head_dim = H // num_heads

    def wspec(shape):
        # Weight index_map is constant across the batch grid, so a second
        # pipeline buffer buys nothing -> single-buffer to halve weight VMEM
        # (matters at real LaBSE sizes on v7x's 64 MiB VMEM).
        n = len(shape)
        return pl.BlockSpec(shape, lambda b, _n=n: (0,) * _n,
                            pipeline_mode=pl.Buffered(1))

    in_specs = [
        pl.BlockSpec((1, S, H), lambda b: (b, 0, 0)),   # x
        pl.BlockSpec((1, 1, S), lambda b: (b, 0, 0)),   # additive mask bias
        wspec((H, 3 * H)), wspec((1, 3 * H)),           # fused wqkv, bqkv
        wspec((H, H)), wspec((1, H)),                   # wo, bo
        wspec((1, H)), wspec((1, H)),                   # ln1 gamma/beta
        wspec((H, I)), wspec((1, I)),                   # wi, bi
        wspec((I, H)), wspec((1, H)),                   # wo2, bo2
        wspec((1, H)), wspec((1, H)),                   # ln2 gamma/beta
    ]

    if pool:
        out_shape = jax.ShapeDtypeStruct((B, H), x.dtype)
        out_specs = pl.BlockSpec((1, H), lambda b: (b, 0))
    else:
        out_shape = jax.ShapeDtypeStruct((B, S, H), x.dtype)
        out_specs = pl.BlockSpec((1, S, H), lambda b: (b, 0, 0))

    kernel = functools.partial(bert_layer_kernel, num_heads, head_dim, pool)
    return pl.pallas_call(
        kernel,
        out_shape=out_shape,
        grid=(B,),
        in_specs=in_specs,
        out_specs=out_specs,
        compiler_params=pltpu.CompilerParams(
            dimension_semantics=("parallel",),
            vmem_limit_bytes=64 * 1024 * 1024),
    )(x, mask_bias,
      p["wqkv"], p["bqkv"], p["wo"], p["bo"], p["ln1_g"], p["ln1_b"],
      p["wi"], p["bi"], p["wo2"], p["bo2"], p["ln2_g"], p["ln2_b"])


# --------------------------- parameter construction ------------------------ #

def init_params(key, vocab, type_vocab, max_pos, H, I, num_layers):
    scale = 0.02
    wdt = jnp.bfloat16   # matmul weights in bf16 (MXU peak dtype); f32 accumulation in-kernel

    def nrm(k, shape, dtype=jnp.float32):
        return (scale * jax.random.normal(k, shape, dtype=jnp.float32)).astype(dtype)

    keys = iter(jax.random.split(key, 4 + num_layers * 4))
    params = {
        "word_emb": nrm(next(keys), (vocab, H)),
        "pos_emb": nrm(next(keys), (max_pos, H)),
        "type_emb": nrm(next(keys), (type_vocab, H)),
        "emb_ln_g": jnp.ones((1, H), jnp.float32),
        "emb_ln_b": jnp.zeros((1, H), jnp.float32),
        "layers": [],
    }
    for _ in range(num_layers):
        params["layers"].append({
            "wqkv": nrm(next(keys), (H, 3 * H), wdt),
            "bqkv": jnp.zeros((1, 3 * H), jnp.float32),
            "wo": nrm(next(keys), (H, H), wdt), "bo": jnp.zeros((1, H), jnp.float32),
            "ln1_g": jnp.ones((1, H), jnp.float32), "ln1_b": jnp.zeros((1, H), jnp.float32),
            "wi": nrm(next(keys), (H, I), wdt), "bi": jnp.zeros((1, I), jnp.float32),
            "wo2": nrm(next(keys), (I, H), wdt), "bo2": jnp.zeros((1, H), jnp.float32),
            "ln2_g": jnp.ones((1, H), jnp.float32), "ln2_b": jnp.zeros((1, H), jnp.float32),
        })
    return params


def labse_encoder_forward(params, input_ids, token_type_ids, attention_mask, num_heads):
    B, S = input_ids.shape
    # Embeddings (gather is glue; done in plain JAX).
    emb = (jnp.take(params["word_emb"], input_ids, axis=0)
           + params["pos_emb"][None, :S, :]
           + jnp.take(params["type_emb"], token_type_ids, axis=0))
    x = _layer_norm(emb, params["emb_ln_g"][None], params["emb_ln_b"][None])
    x = x.astype(jnp.float32)

    # Additive mask bias kept in f32 so padded keys get ~0 softmax weight.
    mask_bias = ((1.0 - attention_mask.astype(jnp.float32)) * -1e4)[:, None, :]  # (B,1,S)

    n = len(params["layers"])
    for li, lp in enumerate(params["layers"]):
        x = bert_layer(x, mask_bias, lp, num_heads, pool=(li == n - 1))

    # Last layer already returned F.normalize(hidden[:, 1:-1, :].sum(dim=1)).
    return x


# ---------------------------------- main ----------------------------------- #

if __name__ == "__main__":
    B, MAX_LEN, H, I = 2, 8, 32, 64
    NUM_HEADS, NUM_LAYERS = 2, 2
    VOCAB, TYPE_VOCAB = 97, 2

    root = jax.random.PRNGKey(0)
    k_params, k_ids = jax.random.split(root)

    params = init_params(k_params, VOCAB, TYPE_VOCAB, MAX_LEN, H, I, NUM_LAYERS)

    # Synthetic "tokenizer" output (padding='max_length', max_length=MAX_LEN).
    input_ids = jax.random.randint(k_ids, (B, MAX_LEN), 1, VOCAB, dtype=jnp.int32)
    token_type_ids = jnp.zeros((B, MAX_LEN), jnp.int32)
    lengths = jnp.array([MAX_LEN, 6], jnp.int32)
    attention_mask = (jnp.arange(MAX_LEN)[None, :] < lengths[:, None]).astype(jnp.int32)
    input_ids = input_ids * attention_mask  # padded positions -> token id 0

    out = labse_encoder_forward(params, input_ids, token_type_ids, attention_mask, NUM_HEADS)
    out = jax.block_until_ready(out)
    assert out.shape == (B, H), out.shape
    print("KERNEL_OK")
</pallas_src>

<mosaic_0001>
module attributes {stable_mosaic.version = 11 : i64} {
  func.func @bert_layer_kernel(%arg0: i32, %arg1: memref<1x8x32xf32, #tpu.memory_space<vmem>>, %arg2: memref<1x1x8xf32, #tpu.memory_space<vmem>>, %arg3: memref<32x96xbf16, #tpu.memory_space<vmem>>, %arg4: memref<1x96xf32, #tpu.memory_space<vmem>>, %arg5: memref<32x32xbf16, #tpu.memory_space<vmem>>, %arg6: memref<1x32xf32, #tpu.memory_space<vmem>>, %arg7: memref<1x32xf32, #tpu.memory_space<vmem>>, %arg8: memref<1x32xf32, #tpu.memory_space<vmem>>, %arg9: memref<32x64xbf16, #tpu.memory_space<vmem>>, %arg10: memref<1x64xf32, #tpu.memory_space<vmem>>, %arg11: memref<64x32xbf16, #tpu.memory_space<vmem>>, %arg12: memref<1x32xf32, #tpu.memory_space<vmem>>, %arg13: memref<1x32xf32, #tpu.memory_space<vmem>>, %arg14: memref<1x32xf32, #tpu.memory_space<vmem>>, %arg15: memref<1x8x32xf32, #tpu.memory_space<vmem>>) attributes {dimension_semantics = [#tpu.dimension_semantics<parallel>], iteration_bounds = array<i64: 2>, scalar_prefetch = 0 : i64, scratch_operands = 0 : i64, tpu.core_type = #tpu.core_type<tc>, window_params = [{transform_indices = @transform_0, window_bounds = array<i64: 1, 8, 32>}, {transform_indices = @transform_1, window_bounds = array<i64: 1, 1, 8>}, {pipeline_mode = #tpu.pipeline_mode<synchronous>, transform_indices = @transform_2, window_bounds = array<i64: 32, 96>}, {pipeline_mode = #tpu.pipeline_mode<synchronous>, transform_indices = @transform_3, window_bounds = array<i64: 1, 96>}, {pipeline_mode = #tpu.pipeline_mode<synchronous>, transform_indices = @transform_4, window_bounds = array<i64: 32, 32>}, {pipeline_mode = #tpu.pipeline_mode<synchronous>, transform_indices = @transform_5, window_bounds = array<i64: 1, 32>}, {pipeline_mode = #tpu.pipeline_mode<synchronous>, transform_indices = @transform_6, window_bounds = array<i64: 1, 32>}, {pipeline_mode = #tpu.pipeline_mode<synchronous>, transform_indices = @transform_7, window_bounds = array<i64: 1, 32>}, {pipeline_mode = #tpu.pipeline_mode<synchronous>, transform_indices = @transform_8, window_bounds = array<i64: 32, 64>}, {pipeline_mode = #tpu.pipeline_mode<synchronous>, transform_indices = @transform_9, window_bounds = array<i64: 1, 64>}, {pipeline_mode = #tpu.pipeline_mode<synchronous>, transform_indices = @transform_10, window_bounds = array<i64: 64, 32>}, {pipeline_mode = #tpu.pipeline_mode<synchronous>, transform_indices = @transform_11, window_bounds = array<i64: 1, 32>}, {pipeline_mode = #tpu.pipeline_mode<synchronous>, transform_indices = @transform_12, window_bounds = array<i64: 1, 32>}, {pipeline_mode = #tpu.pipeline_mode<synchronous>, transform_indices = @transform_13, window_bounds = array<i64: 1, 32>}, {transform_indices = @transform_14, window_bounds = array<i64: 1, 8, 32>}]} {
    %c0 = arith.constant 0 : index
    %c0_0 = arith.constant 0 : index
    %c0_1 = arith.constant 0 : index
    %0 = vector.load %arg1[%c0, %c0_0, %c0_1] : memref<1x8x32xf32, #tpu.memory_space<vmem>>, vector<1x8x32xf32>
    %1 = vector.shape_cast %0 : vector<1x8x32xf32> to vector<8x32xf32>
    %c0_2 = arith.constant 0 : index
    %c0_3 = arith.constant 0 : index
    %c0_4 = arith.constant 0 : index
    %2 = vector.load %arg2[%c0_2, %c0_3, %c0_4] : memref<1x1x8xf32, #tpu.memory_space<vmem>>, vector<1x1x8xf32>
    %3 = vector.shape_cast %2 : vector<1x1x8xf32> to vector<1x8xf32>
    %4 = arith.truncf %1 : vector<8x32xf32> to vector<8x32xbf16>
    %c0_5 = arith.constant 0 : index
    %c0_6 = arith.constant 0 : index
    %5 = vector.load %arg3[%c0_5, %c0_6] : memref<32x96xbf16, #tpu.memory_space<vmem>>, vector<32x96xbf16>
    %cst = arith.constant dense<0.000000e+00> : vector<8x96xf32>
    %6 = tpu.matmul %4, %5, %cst {dimension_numbers = #tpu.dot_dimension_numbers<[1], [0], [0], [1], [0, 0, 1, 1], [], []>} : vector<8x32xbf16>, vector<32x96xbf16>, vector<8x96xf32> -> vector<8x96xf32>
    %c0_7 = arith.constant 0 : index
    %c0_8 = arith.constant 0 : index
    %7 = vector.load %arg4[%c0_7, %c0_8] : memref<1x96xf32, #tpu.memory_space<vmem>>, vector<1x96xf32>
    %8 = vector.broadcast %7 : vector<1x96xf32> to vector<8x96xf32>
    %9 = arith.addf %6, %8 : vector<8x96xf32>
    %10 = vector.extract_strided_slice %9 {offsets = [0, 0], sizes = [8, 16], strides = [1, 1]} : vector<8x96xf32> to vector<8x16xf32>
    %11 = vector.shape_cast %10 : vector<8x16xf32> to vector<1x8x16xf32>
    %12 = vector.extract_strided_slice %9 {offsets = [0, 16], sizes = [8, 16], strides = [1, 1]} : vector<8x96xf32> to vector<8x16xf32>
    %13 = vector.shape_cast %12 : vector<8x16xf32> to vector<1x8x16xf32>
    %14 = tpu.concatenate %11, %13 in 0 : vector<1x8x16xf32>, vector<1x8x16xf32> -> vector<2x8x16xf32>
    %15 = arith.truncf %14 : vector<2x8x16xf32> to vector<2x8x16xbf16>
    %16 = vector.extract_strided_slice %9 {offsets = [0, 32], sizes = [8, 16], strides = [1, 1]} : vector<8x96xf32> to vector<8x16xf32>
    %17 = vector.shape_cast %16 : vector<8x16xf32> to vector<1x8x16xf32>
    %18 = vector.extract_strided_slice %9 {offsets = [0, 48], sizes = [8, 16], strides = [1, 1]} : vector<8x96xf32> to vector<8x16xf32>
    %19 = vector.shape_cast %18 : vector<8x16xf32> to vector<1x8x16xf32>
    %20 = tpu.concatenate %17, %19 in 0 : vector<1x8x16xf32>, vector<1x8x16xf32> -> vector<2x8x16xf32>
    %21 = arith.truncf %20 : vector<2x8x16xf32> to vector<2x8x16xbf16>
    %22 = vector.extract_strided_slice %9 {offsets = [0, 64], sizes = [8, 16], strides = [1, 1]} : vector<8x96xf32> to vector<8x16xf32>
    %23 = vector.shape_cast %22 : vector<8x16xf32> to vector<1x8x16xf32>
    %24 = vector.extract_strided_slice %9 {offsets = [0, 80], sizes = [8, 16], strides = [1, 1]} : vector<8x96xf32> to vector<8x16xf32>
    %25 = vector.shape_cast %24 : vector<8x16xf32> to vector<1x8x16xf32>
    %26 = tpu.concatenate %23, %25 in 0 : vector<1x8x16xf32>, vector<1x8x16xf32> -> vector<2x8x16xf32>
    %27 = arith.truncf %26 : vector<2x8x16xf32> to vector<2x8x16xbf16>
    "tpu.trace_start"() <{level = 10 : i32, message = "hqd,hkd->hqk"}> : () -> ()
    %cst_9 = arith.constant dense<0.000000e+00> : vector<2x8x8xf32>
    %28 = tpu.matmul %15, %21, %cst_9 {dimension_numbers = #tpu.dot_dimension_numbers<[2], [2], [1], [1], [0, 0, 0, 1, 1, 1], [0], [0]>} : vector<2x8x16xbf16>, vector<2x8x16xbf16>, vector<2x8x8xf32> -> vector<2x8x8xf32>
    "tpu.trace_stop"() : () -> ()
    %cst_10 = arith.constant 2.500000e-01 : f32
    %29 = vector.broadcast %cst_10 : f32 to vector<2x8x8xf32>
    %30 = arith.mulf %28, %29 : vector<2x8x8xf32>
    %31 = vector.shape_cast %3 : vector<1x8xf32> to vector<1x1x8xf32>
    %32 = vector.broadcast %31 : vector<1x1x8xf32> to vector<2x8x8xf32>
    %33 = arith.addf %30, %32 : vector<2x8x8xf32>
    %cst_11 = arith.constant dense<0xFF800000> : vector<2x8xf32>
    %34 = vector.multi_reduction <maximumf>, %33, %cst_11 [2] : vector<2x8x8xf32> to vector<2x8xf32>
    %35 = vector.shape_cast %34 : vector<2x8xf32> to vector<2x8x1xf32>
    %36 = vector.broadcast %35 : vector<2x8x1xf32> to vector<2x8x8xf32>
    %37 = arith.subf %33, %36 : vector<2x8x8xf32>
    %38 = math.exp %37 : vector<2x8x8xf32>
    %cst_12 = arith.constant dense<0.000000e+00> : vector<2x8xf32>
    %39 = vector.multi_reduction <add>, %38, %cst_12 [2] : vector<2x8x8xf32> to vector<2x8xf32>
    %40 = vector.shape_cast %39 : vector<2x8xf32> to vector<2x8x1xf32>
    %41 = tpu.reciprocal %40 {approx = true} : vector<2x8x1xf32> -> vector<2x8x1xf32>
    %42 = vector.broadcast %41 : vector<2x8x1xf32> to vector<2x8x8xf32>
    %43 = arith.mulf %38, %42 : vector<2x8x8xf32>
    %44 = arith.truncf %43 : vector<2x8x8xf32> to vector<2x8x8xbf16>
    "tpu.trace_start"() <{level = 10 : i32, message = "hqk,hkd->hqd"}> : () -> ()
    %cst_13 = arith.constant dense<0.000000e+00> : vector<2x8x16xf32>
    %45 = tpu.matmul %44, %27, %cst_13 {dimension_numbers = #tpu.dot_dimension_numbers<[2], [1], [1], [2], [0, 0, 0, 1, 1, 2], [0], [0]>} : vector<2x8x8xbf16>, vector<2x8x16xbf16>, vector<2x8x16xf32> -> vector<2x8x16xf32>
    "tpu.trace_stop"() : () -> ()
    %46 = vector.extract_strided_slice %45 {offsets = [0, 0, 0], sizes = [1, 8, 16], strides = [1, 1, 1]} : vector<2x8x16xf32> to vector<1x8x16xf32>
    %47 = vector.shape_cast %46 : vector<1x8x16xf32> to vector<8x16xf32>
    %48 = vector.extract_strided_slice %45 {offsets = [1, 0, 0], sizes = [1, 8, 16], strides = [1, 1, 1]} : vector<2x8x16xf32> to vector<1x8x16xf32>
    %49 = vector.shape_cast %48 : vector<1x8x16xf32> to vector<8x16xf32>
    %50 = tpu.concatenate %47, %49 in 1 : vector<8x16xf32>, vector<8x16xf32> -> vector<8x32xf32>
    %51 = arith.truncf %50 : vector<8x32xf32> to vector<8x32xbf16>
    %c0_14 = arith.constant 0 : index
    %c0_15 = arith.constant 0 : index
    %52 = vector.load %arg5[%c0_14, %c0_15] : memref<32x32xbf16, #tpu.memory_space<vmem>>, vector<32x32xbf16>
    %cst_16 = arith.constant dense<0.000000e+00> : vector<8x32xf32>
    %53 = tpu.matmul %51, %52, %cst_16 {dimension_numbers = #tpu.dot_dimension_numbers<[1], [0], [0], [1], [0, 0, 1, 1], [], []>} : vector<8x32xbf16>, vector<32x32xbf16>, vector<8x32xf32> -> vector<8x32xf32>
    %c0_17 = arith.constant 0 : index
    %c0_18 = arith.constant 0 : index
    %54 = vector.load %arg6[%c0_17, %c0_18] : memref<1x32xf32, #tpu.memory_space<vmem>>, vector<1x32xf32>
    %55 = vector.broadcast %54 : vector<1x32xf32> to vector<8x32xf32>
    %56 = arith.addf %53, %55 : vector<8x32xf32>
    %57 = arith.addf %1, %56 : vector<8x32xf32>
    %c0_19 = arith.constant 0 : index
    %c0_20 = arith.constant 0 : index
    %58 = vector.load %arg7[%c0_19, %c0_20] : memref<1x32xf32, #tpu.memory_space<vmem>>, vector<1x32xf32>
    %c0_21 = arith.constant 0 : index
    %c0_22 = arith.constant 0 : index
    %59 = vector.load %arg8[%c0_21, %c0_22] : memref<1x32xf32, #tpu.memory_space<vmem>>, vector<1x32xf32>
    %cst_23 = arith.constant dense<0.000000e+00> : vector<8xf32>
    %60 = vector.multi_reduction <add>, %57, %cst_23 [1] : vector<8x32xf32> to vector<8xf32>
    %61 = vector.shape_cast %60 : vector<8xf32> to vector<8x1xf32>
    %cst_24 = arith.constant 3.200000e+01 : f32
    %62 = vector.broadcast %cst_24 : f32 to vector<8x1xf32>
    %63 = arith.divf %61, %62 : vector<8x1xf32>
    %64 = vector.broadcast %63 : vector<8x1xf32> to vector<8x32xf32>
    %65 = arith.subf %57, %64 : vector<8x32xf32>
    %66 = arith.mulf %65, %65 : vector<8x32xf32>
    %cst_25 = arith.constant dense<0.000000e+00> : vector<8xf32>
    %67 = vector.multi_reduction <add>, %66, %cst_25 [1] : vector<8x32xf32> to vector<8xf32>
    %68 = vector.shape_cast %67 : vector<8xf32> to vector<8x1xf32>
    %cst_26 = arith.constant 3.200000e+01 : f32
    %69 = vector.broadcast %cst_26 : f32 to vector<8x1xf32>
    %70 = arith.divf %68, %69 : vector<8x1xf32>
    %71 = vector.broadcast %63 : vector<8x1xf32> to vector<8x32xf32>
    %72 = arith.subf %57, %71 : vector<8x32xf32>
    %cst_27 = arith.constant 9.99999996E-13 : f32
    %73 = vector.broadcast %cst_27 : f32 to vector<8x1xf32>
    %74 = arith.addf %70, %73 : vector<8x1xf32>
    %75 = math.rsqrt %74 : vector<8x1xf32>
    %76 = vector.broadcast %75 : vector<8x1xf32> to vector<8x32xf32>
    %77 = arith.mulf %72, %76 : vector<8x32xf32>
    %78 = vector.broadcast %58 : vector<1x32xf32> to vector<8x32xf32>
    %79 = arith.mulf %77, %78 : vector<8x32xf32>
    %80 = vector.broadcast %59 : vector<1x32xf32> to vector<8x32xf32>
    %81 = arith.addf %79, %80 : vector<8x32xf32>
    %82 = arith.truncf %81 : vector<8x32xf32> to vector<8x32xbf16>
    %c0_28 = arith.constant 0 : index
    %c0_29 = arith.constant 0 : index
    %83 = vector.load %arg9[%c0_28, %c0_29] : memref<32x64xbf16, #tpu.memory_space<vmem>>, vector<32x64xbf16>
    %cst_30 = arith.constant dense<0.000000e+00> : vector<8x64xf32>
    %84 = tpu.matmul %82, %83, %cst_30 {dimension_numbers = #tpu.dot_dimension_numbers<[1], [0], [0], [1], [0, 0, 1, 1], [], []>} : vector<8x32xbf16>, vector<32x64xbf16>, vector<8x64xf32> -> vector<8x64xf32>
    %c0_31 = arith.constant 0 : index
    %c0_32 = arith.constant 0 : index
    %85 = vector.load %arg10[%c0_31, %c0_32] : memref<1x64xf32, #tpu.memory_space<vmem>>, vector<1x64xf32>
    %86 = vector.broadcast %85 : vector<1x64xf32> to vector<8x64xf32>
    %87 = arith.addf %84, %86 : vector<8x64xf32>
    %88 = arith.mulf %87, %87 : vector<8x64xf32>
    %89 = arith.mulf %87, %88 : vector<8x64xf32>
    %cst_33 = arith.constant 4.471500e-02 : f32
    %90 = vector.broadcast %cst_33 : f32 to vector<8x64xf32>
    %91 = arith.mulf %90, %89 : vector<8x64xf32>
    %92 = arith.addf %87, %91 : vector<8x64xf32>
    %cst_34 = arith.constant 0.797884583 : f32
    %93 = vector.broadcast %cst_34 : f32 to vector<8x64xf32>
    %94 = arith.mulf %93, %92 : vector<8x64xf32>
    %95 = math.tanh %94 : vector<8x64xf32>
    %cst_35 = arith.constant 1.000000e+00 : f32
    %96 = vector.broadcast %cst_35 : f32 to vector<8x64xf32>
    %97 = arith.addf %96, %95 : vector<8x64xf32>
    %cst_36 = arith.constant 5.000000e-01 : f32
    %98 = vector.broadcast %cst_36 : f32 to vector<8x64xf32>
    %99 = arith.mulf %98, %97 : vector<8x64xf32>
    %100 = arith.mulf %87, %99 : vector<8x64xf32>
    %101 = arith.truncf %100 : vector<8x64xf32> to vector<8x64xbf16>
    %c0_37 = arith.constant 0 : index
    %c0_38 = arith.constant 0 : index
    %102 = vector.load %arg11[%c0_37, %c0_38] : memref<64x32xbf16, #tpu.memory_space<vmem>>, vector<64x32xbf16>
    %cst_39 = arith.constant dense<0.000000e+00> : vector<8x32xf32>
    %103 = tpu.matmul %101, %102, %cst_39 {dimension_numbers = #tpu.dot_dimension_numbers<[1], [0], [0], [1], [0, 0, 1, 1], [], []>} : vector<8x64xbf16>, vector<64x32xbf16>, vector<8x32xf32> -> vector<8x32xf32>
    %c0_40 = arith.constant 0 : index
    %c0_41 = arith.constant 0 : index
    %104 = vector.load %arg12[%c0_40, %c0_41] : memref<1x32xf32, #tpu.memory_space<vmem>>, vector<1x32xf32>
    %105 = vector.broadcast %104 : vector<1x32xf32> to vector<8x32xf32>
    %106 = arith.addf %103, %105 : vector<8x32xf32>
    %107 = arith.addf %81, %106 : vector<8x32xf32>
    %c0_42 = arith.constant 0 : index
    %c0_43 = arith.constant 0 : index
    %108 = vector.load %arg13[%c0_42, %c0_43] : memref<1x32xf32, #tpu.memory_space<vmem>>, vector<1x32xf32>
    %c0_44 = arith.constant 0 : index
    %c0_45 = arith.constant 0 : index
    %109 = vector.load %arg14[%c0_44, %c0_45] : memref<1x32xf32, #tpu.memory_space<vmem>>, vector<1x32xf32>
    %cst_46 = arith.constant dense<0.000000e+00> : vector<8xf32>
    %110 = vector.multi_reduction <add>, %107, %cst_46 [1] : vector<8x32xf32> to vector<8xf32>
    %111 = vector.shape_cast %110 : vector<8xf32> to vector<8x1xf32>
    %cst_47 = arith.constant 3.200000e+01 : f32
    %112 = vector.broadcast %cst_47 : f32 to vector<8x1xf32>
    %113 = arith.divf %111, %112 : vector<8x1xf32>
    %114 = vector.broadcast %113 : vector<8x1xf32> to vector<8x32xf32>
    %115 = arith.subf %107, %114 : vector<8x32xf32>
    %116 = arith.mulf %115, %115 : vector<8x32xf32>
    %cst_48 = arith.constant dense<0.000000e+00> : vector<8xf32>
    %117 = vector.multi_reduction <add>, %116, %cst_48 [1] : vector<8x32xf32> to vector<8xf32>
    %118 = vector.shape_cast %117 : vector<8xf32> to vector<8x1xf32>
    %cst_49 = arith.constant 3.200000e+01 : f32
    %119 = vector.broadcast %cst_49 : f32 to vector<8x1xf32>
    %120 = arith.divf %118, %119 : vector<8x1xf32>
    %121 = vector.broadcast %113 : vector<8x1xf32> to vector<8x32xf32>
    %122 = arith.subf %107, %121 : vector<8x32xf32>
    %cst_50 = arith.constant 9.99999996E-13 : f32
    %123 = vector.broadcast %cst_50 : f32 to vector<8x1xf32>
    %124 = arith.addf %120, %123 : vector<8x1xf32>
    %125 = math.rsqrt %124 : vector<8x1xf32>
    %126 = vector.broadcast %125 : vector<8x1xf32> to vector<8x32xf32>
    %127 = arith.mulf %122, %126 : vector<8x32xf32>
    %128 = vector.broadcast %108 : vector<1x32xf32> to vector<8x32xf32>
    %129 = arith.mulf %127, %128 : vector<8x32xf32>
    %130 = vector.broadcast %109 : vector<1x32xf32> to vector<8x32xf32>
    %131 = arith.addf %129, %130 : vector<8x32xf32>
    %c0_51 = arith.constant 0 : index
    %c0_52 = arith.constant 0 : index
    %c0_53 = arith.constant 0 : index
    %132 = vector.load %arg15[%c0_51, %c0_52, %c0_53] : memref<1x8x32xf32, #tpu.memory_space<vmem>>, vector<1x8x32xf32>
    %133 = vector.shape_cast %132 : vector<1x8x32xf32> to vector<8x32xf32>
    %134 = vector.shape_cast %131 : vector<8x32xf32> to vector<1x8x32xf32>
    tpu.vector_store %arg15[%c0_51, %c0_52, %c0_53], %134 {strides = array<i32>} : memref<1x8x32xf32, #tpu.memory_space<vmem>>, vector<1x8x32xf32>,
    return
  }
  func.func @transform_0(%arg0: i32) -> (i32, i32, i32) {
    %c0_i32 = arith.constant 0 : i32
    %c0_i32_0 = arith.constant 0 : i32
    %c0_i32_1 = arith.constant 0 : i32
    return %arg0, %c0_i32, %c0_i32_0 : i32, i32, i32
  }
  func.func @transform_1(%arg0: i32) -> (i32, i32, i32) {
    %c0_i32 = arith.constant 0 : i32
    %c0_i32_0 = arith.constant 0 : i32
    %c0_i32_1 = arith.constant 0 : i32
    return %arg0, %c0_i32, %c0_i32_0 : i32, i32, i32
  }
  func.func @transform_2(%arg0: i32) -> (i32, i32) {
    %c0_i32 = arith.constant 0 : i32
    %c0_i32_0 = arith.constant 0 : i32
    %c0_i32_1 = arith.constant 0 : i32
    return %c0_i32, %c0_i32_0 : i32, i32
  }
  func.func @transform_3(%arg0: i32) -> (i32, i32) {
    %c0_i32 = arith.constant 0 : i32
    %c0_i32_0 = arith.constant 0 : i32
    %c0_i32_1 = arith.constant 0 : i32
    return %c0_i32, %c0_i32_0 : i32, i32
  }
  func.func @transform_4(%arg0: i32) -> (i32, i32) {
    %c0_i32 = arith.constant 0 : i32
    %c0_i32_0 = arith.constant 0 : i32
    %c0_i32_1 = arith.constant 0 : i32
    return %c0_i32, %c0_i32_0 : i32, i32
  }
  func.func @transform_5(%arg0: i32) -> (i32, i32) {
    %c0_i32 = arith.constant 0 : i32
    %c0_i32_0 = arith.constant 0 : i32
    %c0_i32_1 = arith.constant 0 : i32
    return %c0_i32, %c0_i32_0 : i32, i32
  }
  func.func @transform_6(%arg0: i32) -> (i32, i32) {
    %c0_i32 = arith.constant 0 : i32
    %c0_i32_0 = arith.constant 0 : i32
    %c0_i32_1 = arith.constant 0 : i32
    return %c0_i32, %c0_i32_0 : i32, i32
  }
  func.func @transform_7(%arg0: i32) -> (i32, i32) {
    %c0_i32 = arith.constant 0 : i32
    %c0_i32_0 = arith.constant 0 : i32
    %c0_i32_1 = arith.constant 0 : i32
    return %c0_i32, %c0_i32_0 : i32, i32
  }
  func.func @transform_8(%arg0: i32) -> (i32, i32) {
    %c0_i32 = arith.constant 0 : i32
    %c0_i32_0 = arith.constant 0 : i32
    %c0_i32_1 = arith.constant 0 : i32
    return %c0_i32, %c0_i32_0 : i32, i32
  }
  func.func @transform_9(%arg0: i32) -> (i32, i32) {
    %c0_i32 = arith.constant 0 : i32
    %c0_i32_0 = arith.constant 0 : i32
    %c0_i32_1 = arith.constant 0 : i32
    return %c0_i32, %c0_i32_0 : i32, i32
  }
  func.func @transform_10(%arg0: i32) -> (i32, i32) {
    %c0_i32 = arith.constant 0 : i32
    %c0_i32_0 = arith.constant 0 : i32
    %c0_i32_1 = arith.constant 0 : i32
    return %c0_i32, %c0_i32_0 : i32, i32
  }
  func.func @transform_11(%arg0: i32) -> (i32, i32) {
    %c0_i32 = arith.constant 0 : i32
    %c0_i32_0 = arith.constant 0 : i32
    %c0_i32_1 = arith.constant 0 : i32
    return %c0_i32, %c0_i32_0 : i32, i32
  }
  func.func @transform_12(%arg0: i32) -> (i32, i32) {
    %c0_i32 = arith.constant 0 : i32
    %c0_i32_0 = arith.constant 0 : i32
    %c0_i32_1 = arith.constant 0 : i32
    return %c0_i32, %c0_i32_0 : i32, i32
  }
  func.func @transform_13(%arg0: i32) -> (i32, i32) {
    %c0_i32 = arith.constant 0 : i32
    %c0_i32_0 = arith.constant 0 : i32
    %c0_i32_1 = arith.constant 0 : i32
    return %c0_i32, %c0_i32_0 : i32, i32
  }
  func.func @transform_14(%arg0: i32) -> (i32, i32, i32) {
    %c0_i32 = arith.constant 0 : i32
    %c0_i32_0 = arith.constant 0 : i32
    %c0_i32_1 = arith.constant 0 : i32
    return %arg0, %c0_i32, %c0_i32_0 : i32, i32, i32
  }
}

</mosaic_0001>

<bundles_post_ra>
// kernel: tpu_custom_call.1
= control target key start
LH: loop header
LB: loop body
LE: loop exit
PB: predicated region body
PF: predicated region fallthrough
CT: control target
= control target key end

     0   :  { %s1602_s0 = inlined_call_operand.vmem [shape: f32[2,8,32], index: 0, kind: input, shape index: {}]   ;;  %s1603_s1 = inlined_call_operand.hbm [shape: f32[2,1,8], index: 1, kind: input, shape index: {}]   ;;  %s1604_s2 = inlined_call_operand.vmem [shape: bf16[32,96], index: 2, kind: input, shape index: {}]   ;;  %s1605_s3 = inlined_call_operand.vmem [shape: f32[1,96], index: 3, kind: input, shape index: {}]   ;;  %s1606_s4 = inlined_call_operand.vmem [shape: bf16[32,32], index: 4, kind: input, shape index: {}]   ;;  %s1607_s5 = inlined_call_operand.vmem [shape: f32[1,32], index: 5, kind: input, shape index: {}]   ;;  %s1608_s6 = inlined_call_operand.vmem [shape: f32[1,32], index: 6, kind: input, shape index: {}]   ;;  %s1609_s7 = inlined_call_operand.vmem [shape: f32[1,32], index: 7, kind: input, shape index: {}]   ;;  %s1610_s8 = inlined_call_operand.hbm [shape: bf16[32,64], index: 8, kind: input, shape index: {}]   ;;  %s1611_s9 = inlined_call_operand.vmem [shape: f32[1,64], index: 9, kind: input, shape index: {}]   ;;  %s1612_s10 = inlined_call_operand.vmem [shape: bf16[64,32], index: 10, kind: input, shape index: {}]   ;;  %s1613_s11 = inlined_call_operand.vmem [shape: f32[1,32], index: 11, kind: input, shape index: {}]   ;;  %s1614_s12 = inlined_call_operand.vmem [shape: f32[1,32], index: 12, kind: input, shape index: {}]   ;;  %s1615_s13 = inlined_call_operand.vmem [shape: f32[1,32], index: 13, kind: input, shape index: {}]   ;;  %s1616_s14 = inlined_call_operand.hbm [shape: f32[2,8,32], index: 14, kind: output, shape index: {}]  }
   0x1   :  { %1622 = sst [smem:[#allocation16_spill]] %s1610_s8 }
   0x2   :  { %1623 = sst [smem:[#allocation17_spill]] %s1615_s13 }
   0x3   :  { %19 = vsyncpa [#allocation3], 0 }
   0x4   :  { %21 = vsyncpa [#allocation3 + $0x1], 0 }
   0x5   :  { %22 = vsyncpa [#allocation6], 0 }
   0x6   :  { %23 = vsyncpa [#allocation4], 0 }
   0x7   :  { %25 = vsyncpa [#allocation4 + $0x1], 0  ;;  %s1380_s29 = smov 0   ;;  %s1382_s30 = smov 0  }
   0x8   :  { %s1384_s15 = smov 0   ;;  %s1386_s16 = smov 0  }
   0x9 LB: > { %1624 = sst [smem:[#allocation11_spill]] %s1283_s29  ;;  %s1404_s20 = sadd.s32 4294967295, %s1295_s16   ;;  %s1295_s16 = sphi %s1386_s16, %s1639_s16   ;;  %s1291_s15 = sphi %s1384_s15, %s1641_s15   ;;  %s1287_s30 = sphi %s1382_s30, %s1643_s30   ;;  %s1283_s29 = sphi %s1380_s29, %s1642_s29  }
   0xa   : > { %1625 = sst [smem:[#allocation12_spill]] %s1291_s15  ;;  %p1007_p0 = scmp.ge.s32.totalorder %s1295_s16, 1 }
   0xb   : > { %1626 = sst [smem:[#allocation13_spill]] %s1295_s16  ;;  %p78_p1 = scmp.eq.s32.totalorder %s1404_s20, 0 }
   0xc   : > { %s1627_s8 = sld [smem:[#allocation16_spill]]  ;;  %p366_p2 = scmp.lt.s32.totalorder %s1295_s16, 3 }
   0xd   : > { %s1297_s22 = smov [#allocation5]   ;;  %s1298_s24 = smov 64  }
   0xe   : > { %p1409_p3 = pnand %p1007_p0, %p366_p2  ;;  %s397_s23 = sshll.u32 %s1297_s22, 4  ;;  %s398_s23 = int_to_ptr.vmem [resolvable:$true] %s397_s23 }
   0xf   : > { %s1299_s25 = smov 4   ;;  %s1006_s26 = sadd.s32 4294967294, %s1295_s16  }
  0x10   : > { %p1084_p4 = pneg %p1409_p3  ;;  %s1420_s27 = sadd.s32 1, %s1295_s16  }
  0x11   : > { %1629 = sst [smem:[#allocation14_spill]] %s1420_s27  ;;  %s64_s28 = sadd.s32 1, %s1291_s15 }
  0x12   : > { %s395_s19 = sshll.u32 %s1627_s8, 4  ;;  %p1085_p6 = pnand %p1084_p4, %p78_p1  ;;  %s396_s19 = int_to_ptr.hbm [resolvable:$true] %s395_s19 }
  0x13   : > { %s61_s17 = ssub.s32 %s1295_s16, %s1420_s27  ;;  %p71_p7 = scmp.ne.s32.totalorder %s1291_s15, %s1287_s30 }
  0x14   : > { %1087 = dma.hbm_to_vmem [thread:$0]  (!%p1085_p6), %s396_s19, 256, %s398_s23, [#allocation6], %s1298_s24, %s1298_s24, %s1299_s25  }
  0x15   : > { %p62_p8 = scmp.eq.s32.totalorder %s61_s17, 0  ;;  %p72_p9 = scmp.eq.s32.totalorder %s1295_s16, 0 }
  0x16   : > { %p77_p10 = scmp.ne.s32.totalorder %s1287_s30, %s1283_s29  ;;  %p353_p11 = scmp.eq.s32.totalorder %s1404_s20, 1 }
  0x17   : > { %s1432_s18 = scalar_select %p62_p8, %s1291_s15, %s64_s28  }
  0x18   : > { %p1436_p12 = por %p78_p1, %p77_p10  ;;  %p1440_p13 = por %p353_p11, %p71_p7 }
  0x19   : > { %1630 = sst [smem:[#allocation15_spill]] %s1432_s18  ;;  %p359_p0 = scmp.eq.s32.totalorder %s1006_s26, 1 }
  0x1a   : > { %p73_p2 = por %p72_p9, %p71_p7  ;;  %s433_s23 = sand.u32 1, %s1291_s15  }
  0x1b   : > { %p1445_p4 = por %p359_p0, %p77_p10  ;;  %p1097_p6 = scmp.lt.s32.totalorder %s1295_s16, 2 }
  0x1c   : > { %s439_s17 = scalar_lea.hbm %s1603_s1, %s1295_s16  ;;  %s436_s18 = scalar_lea.vmem [#allocation2], %s433_s23 }
  0x1d   : > { %s441_s8 = sshll.u32 %s439_s17, 4  ;;  %s443_s27 = sshll.u32 %s436_s18, 4  ;;  %s442_s8 = int_to_ptr.hbm [resolvable:$true] %s441_s8  ;;  %s444_s27 = int_to_ptr.vmem [resolvable:$true] %s443_s27 }
  0x1e   : > { %p1454_p8 = pnand %p1097_p6, %p73_p2  ;;  %s434_s26 = scalar_lea.sflag [#allocation3], %s433_s23 }
  0x1f   : > { %s1195_s15 = sshra.s32 %s442_s8, 4  ;;  %s1202_s18 = scalar_lea.hbm %s1603_s1, 2  ;;  %s1196_s15 = int_to_ptr.hbm [resolvable:$true] %s1195_s15 }
  0x20   : > { %s1197_s13 = scalar_lea.hbm %s1196_s15, 1  ;;  %p1199_p9 = pneg %p1454_p8 }
  0x21   : > { %p1198_p7 = scmp.ne.s32.totalorder %s1196_s15, %s1197_s13  ;;  %p1203_p0 = scmp.lt.s32.totalorder %s1196_s15, %s1603_s1 }
  0x22   : > { %p1204_p2 = scmp.lt.s32.totalorder %s1202_s18, %s1197_s13 }
  0x23   : > { %p1200_p10 = pnand %p1199_p9, %p1198_p7 }
  0x24   : > { %p1205_p6 = por %p1204_p2, %p1203_p0 }
  0x25   : > { %p1201_p11 = pneg %p1200_p10 }
  0x27   : > { %p1206_p5 = pnand %p1205_p6, %p1201_p11 }
  0x29   : > { %1209 = shalt.err (!%p1206_p5)
}
  0x2a   : > { %1091 = dma.hbm_to_vmem [thread:$0]  (!%p1454_p8), %s442_s8, 16, %s444_s27, %s434_s26  }
  0x2b   : > { %452 = sbr.rel (%p1409_p3) target bundleno = 2010 (0x7da), region = 76  ;;  %s1471_s23 = sand.u32 (!%p1409_p3), 1, %s1287_s30  }
  0x2c   : > { %s455_s25 = scalar_lea.sflag (!%p1409_p3), [#allocation3], %s1471_s23  ;;  %s457_s28 = scalar_lea.vmem (!%p1409_p3), [#allocation2], %s1471_s23 }
  0x30   : > { %1270 = dma.done.wait (%p1436_p12), %s455_s25, 16  }
  0x31   : > { %1272 = vsyncadd (%p1436_p12), %s455_s25, 4294967280 }
  0x32   : > { %1274 = dma.done.wait (%p78_p1), [#allocation6], 256  }
  0x33   : > { %1276 = vsyncadd (%p78_p1), [#allocation6], 4294967040  ;;  %p511_p3 = scmp.lt.s32.totalorder %s1404_s20, 1  ;;  %v1067_v0 = vld [vmem:[%s1604_s2 + $0x8] sm:$0xff]  ;;  %v1066_v1 = vld [vmem:[%s1604_s2] sm:$0xff]  ;;  %vm539_vm0 = vcmask 261120  }
  0x34   : > { %549 = vmatpush.bf16.msra.mxu0 %v1067_v0  ;;  %v1140_v4 = vld [vmem:[%s1605_s3] ss:$0 sm:$0xff]  ;;  %s1300_s25 = smov 112   ;;  %vm567_vm1 = vcmask 130048   ;;  %vm648_vm2 = vcmask 1043456   ;;  %vm618_vm3 = vcmask 64512  }
  0x35   : > { %s512_s8 = scalar_select %p511_p3, %s1404_s20, 1  ;;  %v1141_v23 = vld [vmem:[%s457_s28] ss:$0 sm:$0xff]  ;;  %v1069_v54 = vld [vmem:[%s1606_s4 + $0x8] sm:$0xff]  ;;  %vm851_vm8 = vcmask 523264  }
  0x36   : > { %v1068_v55 = vld [vmem:[%s1606_s4] sm:$0xff]  ;;  %s1303_s21 = smov 16   ;;  %s1635_s22 = sld [smem:[#allocation17_spill]] }
  0x37   : > { %s1013_s13 = sshll.u32 %s512_s8, 3  ;;  %s1301_s8 = smov 96   ;;  %v1142_v61 = vld [vmem:[%s1607_s5] ss:$0 sm:$0xff] }
  0x38   : > { %s514_s16 = scalar_lea.vmem %s1602_s0, %s1013_s13  ;;  %550 = vmatpush.bf16.msra.mxu0 %v1066_v1  ;;  %s1302_s13 = smov 64  }
  0x39   : > { %v1494_v2 = vld [vmem:[%s514_s16] sm:$0xff]  ;;  %s903_s17 = scalar_lea.sflag [#allocation4], %s1471_s23 }
  0x3a   : > { %v518_v3 = vpack.c.bf16 %v1494_v2, %v1494_v2 }
  0x3c   : > { %1022 = vmatmul.msk.bf16.vlgmr.msra.gmra.mxu0 %vm539_vm0, %v518_v3 }
  0x3d   : > { %721 = vmatpush.bf16.msrb.mxu0 %v1069_v54 }
  0x41   : > { %722 = vmatpush.bf16.msrb.mxu0 %v1068_v55 }
  0xb9   : > { %v552_v5 = vpop.f32.mrf.mxu0 }
  0xba   : > { %v553_v6 = vadd.f32 %v1140_v4, %v552_v5  ;;  %v1304_v4 = vmov 32.0  }
  0xbc   : > { %v560_v7 = vpack.c.bf16 %v553_v6, %v553_v6  ;;  %557 = vrot.lane.b32.xlu0 %v553_v6, %s1300_s25  ;;  %s1012_s25 = sshll.u32 %s1471_s23, 3 }
  0xbe   : > { %v563_v8 = vunpack.c.l.b16 %v560_v7 }
  0xc0   : > { %v564_v10 = vpack.c.b16 %v563_v8, %v563_v8 }
  0xc1   : > { %v554_v9 = vpop.f32.mrf.mxu0 }
  0xc4   : > { %565 = vrot.lane.b32.xlu0 %v564_v10, %s1301_s8 }
  0xcc   : > { %643 = vrot.lane.b32.xlu0 %v564_v10, %s1302_s13 }
 0x12e   : > { %v558_v11 = vpop.permute.xlu0 %557 }
 0x12f   : > { %v561_v12 = vpack.c.bf16 %v558_v11, %v558_v11 }
 0x131   : > { %v588_v13 = vunpack.c.l.b16 %v561_v12 }
 0x133   : > { %v589_v14 = vpack.c.b16 %v588_v13, %v588_v13 }
 0x135   : > { %590 = vrot.lane.b32.xlu1 %v589_v14, %s1301_s8  ;;  %665 = vrot.lane.b32.xlu0 %v589_v14, %s1302_s13  ;;  %s1063_s8 = sshll.u32 %s1404_s20, 3  ;;  %s510_s20 = scalar_lea.vmem [#allocation7], %s1012_s25 }
 0x136   : > { %v566_v15 = vpop.permute.xlu0 %565  ;;  %s913_s16 = scalar_lea.hbm %s1616_s14, %s1063_s8  ;;  %s915_s26 = sshll.u32 %s510_s20, 4  ;;  %s916_s26 = int_to_ptr.vmem [resolvable:$true] %s915_s26 }
 0x137   : > { %v572_v16 = vsel %vm567_vm1, %v566_v15, 0  ;;  %v1071_v15 = vld [vmem:[#allocation5 + $0x8] sm:$0xff]  ;;  %s917_s18 = sshll.u32 %s913_s16, 4  ;;  %s1245_s25 = scalar_lea.hbm %s1616_s14, 16  ;;  %s918_s18 = int_to_ptr.hbm [resolvable:$true] %s917_s18 }
 0x138   : > { %581 = vmatpush.bf16.xpose.msra.mxu1 %v572_v16  ;;  %v1070_v16 = vld [vmem:[#allocation5] sm:$0xff]  ;;  %s1239_s13 = sshra.s32 %s918_s18, 4  ;;  %s1240_s13 = int_to_ptr.hbm [resolvable:$true] %s1239_s13 }
 0x139   : > { %s1241_s8 = scalar_lea.hbm %s1240_s13, 8  ;;  %p1246_p8 = scmp.lt.s32.totalorder %s1240_s13, %s1616_s14 }
 0x13a   : > { %p1242_p1 = scmp.ne.s32.totalorder %s1240_s13, %s1241_s8  ;;  %p1247_p7 = scmp.lt.s32.totalorder %s1245_s25, %s1241_s8 }
 0x13c   : > { %p1243_p5 = pnand %p1242_p1, %p1440_p13  ;;  %p1248_p9 = por %p1247_p7, %p1246_p8 }
 0x13e   : > { %v644_v17 = vpop.permute.xlu0 %643  ;;  %p1244_p12 = pneg %p1243_p5 }
 0x13f   : > { %1023 = vmatmul.msk.bf16.vlgmr.msra.gmra.mxu1 %vm567_vm1, %v560_v7  ;;  %v650_v18 = vsel %vm648_vm2, %v644_v17, 0 }
 0x140   : > { %659 = vmatpush.bf16.msra.mxu3 %v650_v18  ;;  %798 = vmatpush.bf16.msrb.mxu1 %v1071_v15  ;;  %p1249_p10 = pnand %p1248_p9, %p1244_p12 }
 0x144   : > { %799 = vmatpush.bf16.msrb.mxu1 %v1070_v16 }
 0x1a7   : > { %v591_v19 = vpop.permute.xlu1 %590  ;;  %v666_v20 = vpop.permute.xlu0 %665 }
 0x1a8   : > { %v596_v21 = vsel %vm567_vm1, %v591_v19, 0  ;;  %v671_v22 = vsel %vm648_vm2, %v666_v20, 0 }
 0x1a9   : > { %605 = vmatpush.bf16.xpose.msra.mxu2 %v596_v21  ;;  %680 = vmatpush.bf16.msrb.mxu3 %v671_v22 }
 0x1b0   : > { %1024 = vmatmul.msk.bf16.vlgmr.msra.gmra.mxu2 %vm567_vm1, %v561_v12 }
 0x1bc   : > { %v583_v24 = vpop.f32.mrf.mxu1 }
 0x1bd   : > { %v611_v25 = vmul.f32 0.25, %v583_v24 }
 0x1bf   : > { %v616_v26 = vadd.f32 %v1141_v23, %v611_v25 }
 0x1c1   : > { %v619_v27 = vsel %vm618_vm3, %v616_v26, -inf }
 0x1c2   : > { %620 = vmax.xlane.f32.xlu1 %v619_v27 }
 0x1c4   : > { %v585_v28 = vpop.f32.mrf.mxu1 }
 0x233   : > { %v607_v29 = vpop.f32.mrf.mxu2 }
 0x234   : > { %v612_v30 = vmul.f32 0.25, %v607_v29  ;;  %v1144_v29 = vld [vmem:[%s1609_s7] ss:$0 sm:$0xff] }
 0x235   : > { %v621_v31 = vpop.xlane.xlu1 %620 }
 0x236   : > { %v625_v32 = vsub.f32 %v616_v26, %v621_v31  ;;  %v617_v33 = vadd.f32 %v1141_v23, %v612_v30  ;;  %v1143_v26 = vld [vmem:[%s1608_s6] ss:$0 sm:$0xff] }
 0x238   : > { %v627_v34 = vmul.f32 1.442695, %v625_v32  ;;  %v622_v35 = vsel %vm618_vm3, %v617_v33, -inf }
 0x239   : > { %623 = vmax.xlane.f32.xlu2 %v622_v35  ;;  %v1073_v35 = vld [vmem:[%s1612_s10 + $0x8] sm:$0xff] }
 0x23a   : > { %1149 = vpow2.f32 %v627_v34  ;;  %v1074_v34 = vld [vmem:[%s1612_s10 + $0x10] sm:$0xff] }
 0x23b   : > { %v609_v36 = vpop.f32.mrf.mxu2 }
 0x23c   : > { %v1072_v36 = vld [vmem:[%s1612_s10] sm:$0xff] }
 0x240   : > { %v1150_v37 = vpop.eup %1149 }
 0x241   : > { %v631_v38 = vsel %vm618_vm3, %v1150_v37, 0.0 }
 0x242   : > { %632 = vadd.xlane.f32.xlu2 %v631_v38 }
 0x2ac   : > { %v624_v39 = vpop.xlane.xlu2 %623 }
 0x2ad   : > { %v626_v40 = vsub.f32 %v617_v33, %v624_v39  ;;  %v1075_v33 = vld [vmem:[%s1612_s10 + $0x18] sm:$0xff] }
 0x2ae   : > { %859 = vmatpush.bf16.msrb.mxu2 %v1075_v33 }
 0x2af   : > { %v629_v41 = vmul.f32 1.442695, %v626_v40 }
 0x2b1   : > { %1151 = vpow2.f32 %v629_v41 }
 0x2b2   : > { %860 = vmatpush.bf16.msrb.mxu2 %v1074_v34 }
 0x2b5   : > { %v633_v42 = vpop.xlane.xlu2 %632 }
 0x2b6   : > { %1153 = vrcp.f32 %v633_v42  ;;  %861 = vmatpush.bf16.msrb.mxu2 %v1073_v35 }
 0x2b7   : > { %v1152_v43 = vpop.eup %1151 }
 0x2b8   : > { %v634_v44 = vsel %vm618_vm3, %v1152_v43, 0.0 }
 0x2b9   : > { %635 = vadd.xlane.f32.xlu2 %v634_v44 }
 0x2ba   : > { %862 = vmatpush.bf16.msrb.mxu2 %v1072_v36 }
 0x2bc   : > { %v1154_v45 = vpop.eup %1153 }
 0x2bd   : > { %v639_v46 = vmul.f32 %v1154_v45, %v1150_v37  ;;  %v1145_v37 = vld [vmem:[%s1611_s9] ss:$0 sm:$0xff] }
 0x2bf   : > { %v641_v47 = vpack.c.bf16 %v639_v46, %v639_v46 }
 0x2c1   : > { %1025 = vmatmul.msk.bf16.vlgmr.msra.gmra.mxu3 %vm618_vm3, %v641_v47 }
 0x32c   : > { %v636_v48 = vpop.xlane.xlu2 %635 }
 0x32d   : > { %1155 = vrcp.f32 %v636_v48 }
 0x32e   : > { %1157 = vrcp.f32 %v1304_v4 }
 0x333   : > { %v1156_v49 = vpop.eup %1155 }
 0x334   : > { %v640_v50 = vmul.f32 %v1156_v49, %v1152_v43  ;;  %v1158_v5 = vpop.eup %1157 }
 0x335   : > { %v735_v6 = vmul.f32 32.0, %v1158_v5  ;;  %vm739_vm4 = vweird.f32 %v1158_v5 }
 0x336   : > { %v642_v51 = vpack.c.bf16 %v640_v50, %v640_v50 }
 0x337   : > { %v736_v7 = vsub.f32 1.0, %v735_v6 }
 0x338   : > { %1026 = vmatmul.msk.bf16.vlgmr.msrb.gmra.mxu3 %vm618_vm3, %v642_v51  ;;  %v1146_v51 = vld [vmem:[%s1613_s11] ss:$0 sm:$0xff] }
 0x339   : > { %v737_v8 = vmul.f32 %v1158_v5, %v736_v7 }
 0x33b   : > { %v738_v9 = vadd.f32 %v1158_v5, %v737_v8  ;;  %v1147_v8 = vld [vmem:[%s1614_s12] ss:$0 sm:$0xff] }
 0x33d   : > { %v1527_v10 = vsel %vm739_vm4, %v1158_v5, %v738_v9 }
 0x344   : > { %v661_v52 = vpop.f32.mrf.mxu3 }
 0x34c   : > { %v663_v53 = vpop.f32.mrf.mxu3 }
 0x3bb   : > { %v682_v56 = vpop.f32.mrf.mxu3 }
 0x3bc   : > { %687 = vrot.lane.b32.xlu2 %v682_v56, %s1303_s21 }
 0x3c3   : > { %v684_v57 = vpop.f32.mrf.mxu3 }
 0x416   : > { %v688_v58 = vpop.permute.xlu2 %687 }
 0x417   : > { %v690_v59 = vsel %vm567_vm1, %v661_v52, %v688_v58 }
 0x418   : > { %v691_v60 = vpack.c.bf16 %v690_v59, %v690_v59 }
 0x41a   : > { %1035 = vmatmul.msk.bf16.vlgmr.msrb.gmra.mxu0 %vm539_vm0, %v691_v60 }
 0x497   : > { %v724_v62 = vpop.f32.mrf.mxu0 }
 0x498   : > { %v725_v63 = vadd.f32 %v1142_v61, %v724_v62 }
 0x49a   : > { %v728_v0 = vadd.f32 %v725_v63, %v1494_v2 }
 0x49c   : > { %v731_v1 = vsel %vm539_vm0, %v728_v0, 0.0 }
 0x49d   : > { %732 = vadd.xlane.f32.xlu0 %v731_v1 }
 0x49f   : > { %v726_v3 = vpop.f32.mrf.mxu0 }
 0x510   : > { %v733_v11 = vpop.xlane.xlu0 %732 }
 0x511   : > { %v741_v12 = vmul.f32 %v1527_v10, %v733_v11  ;;  %v1148_v11 = vld [vmem:[%s1635_s22] ss:$0 sm:$0xff] }
 0x513   : > { %v742_v13 = vsub.f32 %v728_v0, %v741_v12 }
 0x515   : > { %v743_v14 = vmul.f32 %v742_v13, %v742_v13 }
 0x517   : > { %v744_v2 = vsel %vm539_vm0, %v743_v14, 0.0 }
 0x518   : > { %745 = vadd.xlane.f32.xlu2 %v744_v2 }
 0x58b   : > { %v746_v17 = vpop.xlane.xlu2 %745 }
 0x58c   : > { %v747_v18 = vmul.f32 %v746_v17, %v1527_v10 }
 0x58e   : > { %v748_v19 = vadd.f32 1e-12, %v747_v18 }
 0x590   : > { %1159 = vrsqrt.f32 %v748_v19  ;;  %vm755_vm6 = vweird.f32 %v748_v19 }
 0x596   : > { %v1160_v20 = vpop.eup %1159 }
 0x597   : > { %v750_v21 = vmul.f32 %v1160_v20, %v748_v19  ;;  %vm756_vm5 = vweird.f32 %v1160_v20 }
 0x598   : > { %vm757_vm7 = vmor %vm755_vm6, %vm756_vm5 }
 0x599   : > { %v751_v22 = vmul.f32 %v1160_v20, %v750_v21 }
 0x59b   : > { %v752_v23 = vmul.f32 0.5, %v751_v22 }
 0x59d   : > { %v753_v24 = vsub.f32 1.5, %v752_v23 }
 0x59f   : > { %v754_v25 = vmul.f32 %v1160_v20, %v753_v24 }
 0x5a1   : > { %v758_v27 = vsel %vm757_vm7, %v1160_v20, %v754_v25 }
 0x5a2   : > { %v759_v28 = vmul.f32 %v758_v27, %v742_v13 }
 0x5a4   : > { %v763_v30 = vmul.f32 %v1143_v26, %v759_v28 }
 0x5a6   : > { %v767_v31 = vadd.f32 %v1144_v29, %v763_v30 }
 0x5a8   : > { %v768_v32 = vpack.c.bf16 %v767_v31, %v767_v31 }
 0x5aa   : > { %1044 = vmatmul.msk.bf16.vlgmr.msrb.gmra.mxu1 %vm539_vm0, %v768_v32 }
 0x627   : > { %v801_v38 = vpop.f32.mrf.mxu1 }
 0x628   : > { %v802_v39 = vadd.f32 %v1145_v37, %v801_v38 }
 0x62a   : > { %v805_v40 = vmul.f32 %v802_v39, %v802_v39 }
 0x62c   : > { %v806_v41 = vmul.f32 %v805_v40, %v802_v39 }
 0x62e   : > { %v807_v42 = vmul.f32 0.044715, %v806_v41 }
 0x62f   : > { %v803_v43 = vpop.f32.mrf.mxu1 }
 0x630   : > { %v808_v44 = vadd.f32 %v807_v42, %v802_v39 }
 0x632   : > { %v809_v45 = vmul.f32 0.7978846, %v808_v44 }
 0x634   : > { %1161 = vtanh.f32 %v809_v45 }
 0x63a   : > { %v1162_v46 = vpop.eup %1161 }
 0x63b   : > { %v811_v47 = vadd.f32 1.0, %v1162_v46 }
 0x63d   : > { %v812_v48 = vmul.f32 0.5, %v811_v47 }
 0x63f   : > { %v813_v49 = vmul.f32 %v812_v48, %v802_v39 }
 0x641   : > { %v814_v50 = vpack.c.bf16 %v813_v49, %v813_v49 }
 0x643   : > { %1061 = vmatmul.msk.bf16.vlgmr.msrb.gmra.mxu2 %vm851_vm8, %v814_v50 }
 0x6c6   : > { %v864_v52 = vpop.f32.mrf.mxu2 }
 0x6c7   : > { %v865_v53 = vadd.f32 %v1146_v51, %v864_v52 }
 0x6c9   : > { %v868_v54 = vadd.f32 %v865_v53, %v767_v31 }
 0x6cb   : > { %v871_v55 = vsel %vm539_vm0, %v868_v54, 0.0 }
 0x6cc   : > { %872 = vadd.xlane.f32.xlu1 %v871_v55 }
 0x6ce   : > { %v866_v56 = vpop.f32.mrf.mxu2 }
 0x73f   : > { %v873_v57 = vpop.xlane.xlu1 %872 }
 0x740   : > { %v874_v58 = vmul.f32 %v873_v57, %v1527_v10 }
 0x742   : > { %v875_v59 = vsub.f32 %v868_v54, %v874_v58 }
 0x744   : > { %v876_v60 = vmul.f32 %v875_v59, %v875_v59 }
 0x746   : > { %v877_v61 = vsel %vm539_vm0, %v876_v60, 0.0 }
 0x747   : > { %878 = vadd.xlane.f32.xlu1 %v877_v61 }
 0x7ba   : > { %v879_v62 = vpop.xlane.xlu1 %878 }
 0x7bb   : > { %v880_v63 = vmul.f32 %v879_v62, %v1527_v10 }
 0x7bd   : > { %v881_v0 = vadd.f32 1e-12, %v880_v63 }
 0x7bf   : > { %1163 = vrsqrt.f32 %v881_v0  ;;  %vm888_vm10 = vweird.f32 %v881_v0 }
 0x7c5   : > { %v1164_v1 = vpop.eup %1163 }
 0x7c6   : > { %v883_v3 = vmul.f32 %v1164_v1, %v881_v0  ;;  %vm889_vm9 = vweird.f32 %v1164_v1 }
 0x7c7   : > { %vm890_vm11 = vmor %vm888_vm10, %vm889_vm9 }
 0x7c8   : > { %v884_v4 = vmul.f32 %v1164_v1, %v883_v3 }
 0x7ca   : > { %v885_v5 = vmul.f32 0.5, %v884_v4 }
 0x7cc   : > { %v886_v6 = vsub.f32 1.5, %v885_v5 }
 0x7ce   : > { %v887_v7 = vmul.f32 %v1164_v1, %v886_v6 }
 0x7d0   : > { %v891_v9 = vsel %vm890_vm11, %v1164_v1, %v887_v7 }
 0x7d1   : > { %v892_v10 = vmul.f32 %v891_v9, %v875_v59 }
 0x7d3   : > { %v896_v12 = vmul.f32 %v1147_v8, %v892_v10 }
 0x7d5   : > { %v900_v13 = vadd.f32 %v1148_v11, %v896_v12 }
 0x7d7   : > { %901 = vst.msk [vmem:[%s510_s20] sm:$0xff] %vm539_vm0, %v900_v13 }
 0x7d8   : > { %1252 = shalt.err (!%p1249_p10)
}
 0x7d9   : > { %1082 = dma.vmem_to_hbm [thread:$0]  (%p1440_p13), %s916_s26, 128, %s918_s18, %s903_s17  }
 0x7da PF: > { %s1636_s23 = sld [smem:[#allocation11_spill]] }
 0x7db   : > { %s1637_s21 = sld [smem:[#allocation13_spill]] }
 0x7e0   : > { %s929_s27 = sand.u32 1, %s1636_s23  }
 0x7e1   : > { %p1638_p11 = scmp.ge.s32.totalorder %s1637_s21, 2  ;;  %s930_s22 = scalar_lea.sflag [#allocation4], %s929_s27 }
 0x7e3   : > { %p1093_p0 = pnand %p1638_p11, %p1445_p4 }
 0x7e5   : > { %p1094_p2 = pneg %p1093_p0 }
 0x7e7   : > { %1278 = dma.done.wait (%p1094_p2), %s930_s22, 128  }
 0x7e8   : > { %1280 = vsyncadd (%p1094_p2), %s930_s22, 4294967168  ;;  %s1639_s16 = sld [smem:[#allocation14_spill]]  ;;  %s1642_s29 = smov %s1287_s30 }
 0x7e9   : > { %s1640_s20 = sld [smem:[#allocation12_spill]] }
 0x7ea   : > { %s1641_s15 = sld [smem:[#allocation15_spill]] }
 0x7ee   : > { %p28_p6 = scmp.ge.s32.totalorder %s1639_s16, 4  }
 0x7ef   : > { %s1643_s30 = smov %s1640_s20 }
 0x7f0   :  { %30 = sbr.rel (!%p28_p6) target bundleno = 9 (0x9), region = 128 }
 0x7f5   :  { %936 = vsyncpa [#allocation3], 1 }
 0x7f6   :  { %938 = vsyncpa [#allocation3 + $0x1], 1 }
 0x7f7   :  { %939 = vsyncpa [#allocation6], 1 }
 0x7f8   :  { %940 = vsyncpa [#allocation4], 1 }
 0x7f9   :  { %942 = vsyncpa [#allocation4 + $0x1], 1 }

</bundles_post_ra>
